<compile_context>
chip_gen: v7x
topology: tpu7x:2x2x1
jax: 0.10.0
libtpu: 0.0.40
codegen_flags: <defaults>
</compile_context>

<pallas_src>
import jax
import jax.numpy as jnp
from jax.experimental import pallas as pl
from jax.experimental.pallas import tpu as pltpu


def _copy_kernel(x_ref, o_ref):
    # Hot path: one full-width VMEM tile copy (vld -> vst), nothing else.
    o_ref[...] = x_ref[...]


def identity_map(x, *args, **kwargs):
    """Faithful IdentityMap.forward: identity, zero bytes moved."""
    return x


def identity_map_pallas(x, *, target_tile_bytes=2 * 1024 * 1024):
    """Pallas copy with the output aliased onto the input buffer.

    When the caller donates `x`, the alias is a true in-place no-op allocation;
    otherwise XLA inserts a defensive copy (still correct).
    """
    orig_shape = x.shape
    n = x.size
    itemsize = jnp.dtype(x.dtype).itemsize

    # ---- Pick a lane-dense 2D view: (rows, lane) with lane a multiple of 128.
    lane = None
    for cand in (1024, 512, 256, 128):
        if n % cand == 0:
            lane = cand
            break

    if lane is None:
        # Not 128-divisible: a single whole-array block is always legal.
        ndim = len(orig_shape)
        return pl.pallas_call(
            _copy_kernel,
            out_shape=jax.ShapeDtypeStruct(orig_shape, x.dtype),
            grid=(1,),
            in_specs=[pl.BlockSpec(orig_shape, lambda i: (0,) * ndim)],
            out_specs=pl.BlockSpec(orig_shape, lambda i: (0,) * ndim),
            input_output_aliases={0: 0},
        )(x)

    rows = n // lane
    x2 = x.reshape(rows, lane)

    # ---- Pick a row-block: dtype-packed sublane multiple, ~target_tile_bytes,
    # and (when rows allow) at least 2 grid steps for v7x dual-TC balance.
    sub = max(8, 32 // itemsize)          # f32 -> 8, bf16 -> 16, int8/fp8 -> 32
    bytes_per_row = lane * itemsize
    max_block_rows = max(1, target_tile_bytes // bytes_per_row)
    if rows >= 2 * sub:
        max_block_rows = min(max_block_rows, rows // 2)

    block_rows = None
    r = sub
    limit = min(rows, max_block_rows)
    while r <= limit:
        if rows % r == 0:
            block_rows = r
        r += sub
    if block_rows is None:
        block_rows = rows                 # full extent along rows -> always legal

    grid = (rows // block_rows,)

    y2 = pl.pallas_call(
        _copy_kernel,
        out_shape=jax.ShapeDtypeStruct((rows, lane), x.dtype),
        grid=grid,
        in_specs=[pl.BlockSpec((block_rows, lane), lambda i: (i, 0))],
        out_specs=pl.BlockSpec((block_rows, lane), lambda i: (i, 0)),
        input_output_aliases={0: 0},
        compiler_params=pltpu.CompilerParams(
            dimension_semantics=("parallel",),
        ),
    )(x2)
    return y2.reshape(orig_shape)


def identity_map_config():
    # Mirrors the PyTorch module's `config` property (no compute involved).
    return {"mm_projector_type": "identity"}


if __name__ == "__main__":
    key = jax.random.PRNGKey(0)
    # Small projector-like input: (batch=2, seq=8, hidden=32)
    x = jax.random.normal(key, (2, 8, 32), dtype=jnp.float32)

    # 1) Faithful forward: pure identity, zero bytes moved.
    y_id = identity_map(x)
    assert y_id.shape == x.shape and y_id.dtype == x.dtype
    assert bool(jnp.all(y_id == x))

    # 2) Pallas copy path (aliased output), exercising the lane-dense branch.
    y = identity_map_pallas(x)
    jax.block_until_ready(y)
    assert y.shape == x.shape and y.dtype == x.dtype
    assert bool(jnp.all(y == x))

    # 3) Pallas fallback branch (shape not divisible by 128).
    x_odd = jax.random.normal(key, (3, 5, 7), dtype=jnp.float32)
    y_odd = identity_map_pallas(x_odd)
    jax.block_until_ready(y_odd)
    assert y_odd.shape == x_odd.shape and y_odd.dtype == x_odd.dtype
    assert bool(jnp.all(y_odd == x_odd))

    assert identity_map_config() == {"mm_projector_type": "identity"}
    print("KERNEL_OK")
</pallas_src>

<mosaic_0001>
module attributes {stable_mosaic.version = 11 : i64} {
  func.func @_copy_kernel(%arg0: i32, %arg1: memref<1x512xf32, #tpu.memory_space<vmem>>, %arg2: memref<1x512xf32, #tpu.memory_space<vmem>>) attributes {dimension_semantics = [#tpu.dimension_semantics<parallel>], iteration_bounds = array<i64: 1>, scalar_prefetch = 0 : i64, scratch_operands = 0 : i64, tpu.core_type = #tpu.core_type<tc>, window_params = [{transform_indices = @transform_0, window_bounds = array<i64: 1, 512>}, {transform_indices = @transform_1, window_bounds = array<i64: 1, 512>}]} {
    %c0 = arith.constant 0 : index
    %c0_0 = arith.constant 0 : index
    %0 = vector.load %arg1[%c0, %c0_0] : memref<1x512xf32, #tpu.memory_space<vmem>>, vector<1x512xf32>
    %c0_1 = arith.constant 0 : index
    %c0_2 = arith.constant 0 : index
    %1 = vector.load %arg2[%c0_1, %c0_2] : memref<1x512xf32, #tpu.memory_space<vmem>>, vector<1x512xf32>
    tpu.vector_store %arg2[%c0_1, %c0_2], %0 {strides = array<i32>} : memref<1x512xf32, #tpu.memory_space<vmem>>, vector<1x512xf32>,
    return
  }
  func.func @transform_0(%arg0: i32) -> (i32, i32) {
    %c0_i32 = arith.constant 0 : i32
    %c0_i32_0 = arith.constant 0 : i32
    return %arg0, %c0_i32 : i32, i32
  }
  func.func @transform_1(%arg0: i32) -> (i32, i32) {
    %c0_i32 = arith.constant 0 : i32
    %c0_i32_0 = arith.constant 0 : i32
    return %arg0, %c0_i32 : i32, i32
  }
}

</mosaic_0001>

<bundles_post_ra>
// kernel: tpu_custom_call.1
= control target key start
LH: loop header
LB: loop body
LE: loop exit
PB: predicated region body
PF: predicated region fallthrough
CT: control target
= control target key end

     0   :  { %6 = vsyncpa [#allocation3], 0  ;;  %s128_s0 = inlined_call_operand.hbm [shape: f32[1,512], index: 0, kind: input, shape index: {}, may-alias: {0,1}]   ;;  %s129_s1 = inlined_call_operand.hbm [shape: f32[1,512], index: 1, kind: output, shape index: {}, may-alias: {0,1}]  }
   0x1   :  { %7 = vsyncpa [#allocation4], 0  ;;  %s92_s6 = smov [#allocation2]   ;;  %s44_s10 = scalar_lea.hbm %s128_s0, 64 }
   0x2   :  { %s14_s7 = sshll.u32 %s92_s6, 4  ;;  %p45_p0 = scmp.ne.s32.totalorder %s128_s0, %s44_s10  ;;  %s15_s7 = int_to_ptr.vmem [resolvable:$true] %s14_s7 }
   0x3   :  { %p48_p1 = scmp.lt.u32.totalorder %s44_s10, %s128_s0 }
   0x5   :  { %p50_p2 = pnand %p48_p1, %p45_p0 }
   0x7   :  { %53 = shalt.err (!%p50_p2)
}
   0x8   :  { %s54_s15 = scalar_lea.vmem %s15_s7, 64  ;;  %p59_p4 = scmp.lt.s32.totalorder %s15_s7, %s15_s7 }
   0x9   :  { %p55_p3 = scmp.ne.s32.totalorder %s15_s7, %s54_s15  ;;  %p60_p5 = scmp.lt.s32.totalorder %s54_s15, %s54_s15 }
   0xb   :  { %p61_p6 = por %p60_p5, %p59_p4 }
   0xd   :  { %p62_p7 = pnand %p61_p6, %p55_p3 }
   0xf   :  { %65 = shalt.err (!%p62_p7)
}
  0x10   :  { %17 = dma.hbm_to_vmem [thread:$0]  %s128_s0, 64, %s15_s7, [#allocation3]  }
  0x11   :  { %88 = dma.done.wait [#allocation3], 64  }
  0x12   :  { %89 = vsyncadd [#allocation3], 4294967232  ;;  %v22_v0 = vlaneseq  ;;  %s93_s18 = smov [#allocation5]   ;;  %v21_v1 = vld [vmem:[#allocation2] sm:$0xf] }
  0x13   :  { %s33_s19 = sshll.u32 %s93_s18, 4  ;;  %s34_s19 = int_to_ptr.vmem [resolvable:$true] %s33_s19 }
  0x14   :  { %vm24_vm0 = vcmp.lt.s32.totalorder %v22_v0, 512  ;;  %s66_s20 = scalar_lea.vmem %s34_s19, 64  ;;  %p71_p9 = scmp.lt.s32.totalorder %s34_s19, %s34_s19 }
  0x15   :  { %26 = vst.msk [vmem:[#allocation5] sm:$0xf] %vm24_vm0, %v21_v1  ;;  %p67_p8 = scmp.ne.s32.totalorder %s34_s19, %s66_s20  ;;  %p72_p10 = scmp.lt.s32.totalorder %s66_s20, %s66_s20 }
  0x17   :  { %p73_p11 = por %p72_p10, %p71_p9 }
  0x19   :  { %p74_p12 = pnand %p73_p11, %p67_p8 }
  0x1b   :  { %77 = shalt.err (!%p74_p12)
}
  0x1c   :  { %s78_s0 = scalar_lea.hbm %s129_s1, 64 }
  0x1d   :  { %p79_p13 = scmp.ne.s32.totalorder %s129_s1, %s78_s0  ;;  %p82_p0 = scmp.lt.u32.totalorder %s78_s0, %s129_s1 }
  0x1f   :  { %p84_p1 = pnand %p82_p0, %p79_p13 }
  0x21   :  { %87 = shalt.err (!%p84_p1)
}
  0x22   :  { %36 = dma.vmem_to_hbm [thread:$0]  %s34_s19, 64, %s129_s1, [#allocation4]  }
  0x23   :  { %90 = dma.done.wait [#allocation4], 64  }
  0x24   :  { %91 = vsyncadd [#allocation4], 4294967232 }
  0x25   :  { %40 = vsyncpa [#allocation3], 1 }
  0x26   :  { %41 = vsyncpa [#allocation4], 1 }

</bundles_post_ra>
